<compile_context>
chip_gen: v6e
topology: v6e:2x2x1
jax: 0.10.0
libtpu: 0.0.40
codegen_flags: <defaults>
</compile_context>

<pallas_src>
import functools

import jax
import jax.numpy as jnp
from jax.experimental import pallas as pl
from jax.experimental.pallas import tpu as pltpu

IN_FEATURES = 2
OUT_FEATURES = 1
LANE = 128  # batch elements per lane-row


def perceptron_kernel(params_ref, x_ref, o_ref):
    """params_ref: SMEM (3,) = [w0, w1, bias]; x_ref: VMEM (2, tr, 128);
    o_ref: VMEM (tr, 128) -- one sigmoid output per lane."""
    w0 = params_ref[0]
    w1 = params_ref[1]
    b = params_ref[2]

    # z = x0*w0 + x1*w1 + b   -- two VPU FMAs, no MXU involved.
    z = x_ref[0] * w0 + x_ref[1] * w1 + b

    # sigmoid(z) = 1 / (1 + exp(-z)); exp and reciprocal both run on the EUP
    # (exact reciprocal so the result matches jax.nn.sigmoid to ~1 ulp).
    o_ref[...] = pl.reciprocal(1.0 + jnp.exp(-z), approx=False)


@functools.partial(jax.jit, static_argnames=("rows_per_tile",))
def perceptron_forward(x, weight, bias, *, rows_per_tile=8):
    """x: [B, 2] f32, weight: [1, 2] f32 (torch Linear layout), bias: [1] f32.

    Returns sigmoid(x @ weight.T + bias) with shape [B, 1].
    """
    B = x.shape[0]

    # Batch goes on the lane axis: n_rows lane-rows of 128 batch elements.
    n_rows = -(-B // LANE)                       # ceil(B / 128)
    if n_rows >= rows_per_tile:
        # Round rows up so the grid tiles evenly; each tile = rows_per_tile*128
        # batch elements (8 rows -> 8 KiB of x per step, trivially VMEM-safe).
        n_rows = -(-n_rows // rows_per_tile) * rows_per_tile
        tile_rows = rows_per_tile
    else:
        tile_rows = n_rows                       # single full-extent block
    b_pad = n_rows * LANE

    # Parameters as 3 SMEM scalars (12 bytes of real data, no padded weight).
    params = jnp.concatenate(
        [weight.reshape(-1), bias.reshape(-1)]
    ).astype(jnp.float32)                        # (3,) = [w0, w1, bias]

    # Lane-dense input layout: pad batch, then [B_pad, 2] -> [2, n_rows, 128].
    x_pad = jnp.pad(x.astype(jnp.float32), ((0, b_pad - B), (0, 0)))
    x_lanes = x_pad.T.reshape(IN_FEATURES, n_rows, LANE)

    grid = (n_rows // tile_rows,)

    out = pl.pallas_call(
        perceptron_kernel,
        out_shape=jax.ShapeDtypeStruct((n_rows, LANE), jnp.float32),
        grid=grid,
        in_specs=[
            # Whole (3,) param vector lives in SMEM for every grid step.
            pl.BlockSpec(memory_space=pltpu.MemorySpace.SMEM),
            # x tile: all 2 features, tile_rows lane-rows.
            pl.BlockSpec((IN_FEATURES, tile_rows, LANE), lambda i: (0, i, 0)),
        ],
        out_specs=pl.BlockSpec((tile_rows, LANE), lambda i: (i, 0)),
        compiler_params=pltpu.CompilerParams(
            dimension_semantics=("parallel",),   # batch tiles are independent
        ),
    )(params, x_lanes)

    # Undo the lane-dense layout: (n_rows, 128) -> flat batch -> [B, 1].
    return out.reshape(b_pad)[:B].reshape(B, OUT_FEATURES)


if __name__ == "__main__":
    key = jax.random.PRNGKey(0)
    k_x, k_w, k_b = jax.random.split(key, 3)

    batch = 8
    # Deterministic synthetic params, matching torch.nn.Linear(2, 1) init
    # bound of 1/sqrt(in_features).
    bound = 1.0 / (IN_FEATURES ** 0.5)
    weight = jax.random.uniform(
        k_w, (OUT_FEATURES, IN_FEATURES), jnp.float32, -bound, bound
    )
    bias = jax.random.uniform(k_b, (OUT_FEATURES,), jnp.float32, -bound, bound)
    x = jax.random.normal(k_x, (batch, IN_FEATURES), jnp.float32)

    out = perceptron_forward(x, weight, bias)
    jax.block_until_ready(out)

    # Pure-JAX reference check of the same semantics.
    ref = jax.nn.sigmoid(x @ weight.T + bias)
    assert out.shape == (batch, OUT_FEATURES)
    assert jnp.allclose(out, ref, atol=1e-6), "mismatch vs reference"

    print("KERNEL_OK")
</pallas_src>

<mosaic_0001>
module attributes {stable_mosaic.version = 11 : i64} {
  func.func @perceptron_kernel(%arg0: i32, %arg1: memref<3xf32, #tpu.memory_space<smem>>, %arg2: memref<2x1x128xf32, #tpu.memory_space<vmem>>, %arg3: memref<1x128xf32, #tpu.memory_space<vmem>>) attributes {dimension_semantics = [#tpu.dimension_semantics<parallel>], iteration_bounds = array<i64: 1>, scalar_prefetch = 0 : i64, scratch_operands = 0 : i64, tpu.core_type = #tpu.core_type<tc>, window_params = [{transform_indices = @transform_0, window_bounds = array<i64: 3>}, {transform_indices = @transform_1, window_bounds = array<i64: 2, 1, 128>}, {transform_indices = @transform_2, window_bounds = array<i64: 1, 128>}]} {
    %c0 = arith.constant 0 : index
    %0 = memref.load %arg1[%c0] : memref<3xf32, #tpu.memory_space<smem>>
    %c1 = arith.constant 1 : index
    %1 = memref.load %arg1[%c1] : memref<3xf32, #tpu.memory_space<smem>>
    %c2 = arith.constant 2 : index
    %2 = memref.load %arg1[%c2] : memref<3xf32, #tpu.memory_space<smem>>
    %c0_0 = arith.constant 0 : index
    %c0_1 = arith.constant 0 : index
    %c0_2 = arith.constant 0 : index
    %3 = vector.load %arg2[%c0_0, %c0_1, %c0_2] : memref<2x1x128xf32, #tpu.memory_space<vmem>>, vector<1x1x128xf32>
    %4 = vector.shape_cast %3 : vector<1x1x128xf32> to vector<1x128xf32>
    %5 = vector.broadcast %0 : f32 to vector<1x128xf32>
    %6 = arith.mulf %4, %5 : vector<1x128xf32>
    %c1_3 = arith.constant 1 : index
    %c0_4 = arith.constant 0 : index
    %c0_5 = arith.constant 0 : index
    %7 = vector.load %arg2[%c1_3, %c0_4, %c0_5] : memref<2x1x128xf32, #tpu.memory_space<vmem>>, vector<1x1x128xf32>
    %8 = vector.shape_cast %7 : vector<1x1x128xf32> to vector<1x128xf32>
    %9 = vector.broadcast %1 : f32 to vector<1x128xf32>
    %10 = arith.mulf %8, %9 : vector<1x128xf32>
    %11 = arith.addf %6, %10 : vector<1x128xf32>
    %12 = vector.broadcast %2 : f32 to vector<1x128xf32>
    %13 = arith.addf %11, %12 : vector<1x128xf32>
    %cst = arith.constant 0.000000e+00 : f32
    %14 = vector.broadcast %cst : f32 to vector<1x128xf32>
    %15 = arith.subf %14, %13 : vector<1x128xf32>
    %16 = math.exp %15 : vector<1x128xf32>
    %cst_6 = arith.constant 1.000000e+00 : f32
    %17 = vector.broadcast %cst_6 : f32 to vector<1x128xf32>
    %18 = arith.addf %17, %16 : vector<1x128xf32>
    %19 = tpu.reciprocal %18 : vector<1x128xf32> -> vector<1x128xf32>
    %c0_7 = arith.constant 0 : index
    %c0_8 = arith.constant 0 : index
    %20 = vector.load %arg3[%c0_7, %c0_8] : memref<1x128xf32, #tpu.memory_space<vmem>>, vector<1x128xf32>
    tpu.vector_store %arg3[%c0_7, %c0_8], %19 {strides = array<i32>} : memref<1x128xf32, #tpu.memory_space<vmem>>, vector<1x128xf32>,
    return
  }
  func.func @transform_0(%arg0: i32) -> i32 {
    %c0_i32 = arith.constant 0 : i32
    %c0_i32_0 = arith.constant 0 : i32
    return %c0_i32 : i32
  }
  func.func @transform_1(%arg0: i32) -> (i32, i32, i32) {
    %c0_i32 = arith.constant 0 : i32
    %c0_i32_0 = arith.constant 0 : i32
    %c0_i32_1 = arith.constant 0 : i32
    return %c0_i32, %arg0, %c0_i32_0 : i32, i32, i32
  }
  func.func @transform_2(%arg0: i32) -> (i32, i32) {
    %c0_i32 = arith.constant 0 : i32
    %c0_i32_0 = arith.constant 0 : i32
    return %arg0, %c0_i32 : i32, i32
  }
}

</mosaic_0001>

<bundles_post_ra>
// kernel: perceptron_forward.1
= control target key start
LH: loop header
LB: loop body
LE: loop exit
PB: predicated region body
PF: predicated region fallthrough
CT: control target
= control target key end

     0   :  { %7 = vsyncpa [#allocation3], 0  ;;  %s98_s0 = inlined_call_operand.vmem [shape: f32[3], index: 0, kind: input, shape index: {}]   ;;  %s99_s1 = inlined_call_operand.vmem [shape: f32[2,1,128], index: 1, kind: input, shape index: {}]   ;;  %s100_s2 = inlined_call_operand.vmem [shape: f32[1,128], index: 2, kind: output, shape index: {}]  }
   0x1   :  { %s14_s11 = sshll.u32 %s98_s0, 4  ;;  %s15_s11 = int_to_ptr.vmem [resolvable:$true] %s14_s11 }
   0x2   :  { %s56_s12 = scalar_lea.vmem %s15_s11, 16  ;;  %p61_p1 = scmp.lt.s32.totalorder %s15_s11, %s15_s11 }
   0x3   :  { %p57_p0 = scmp.ne.s32.totalorder %s15_s11, %s56_s12  ;;  %p62_p2 = scmp.lt.s32.totalorder %s56_s12, %s56_s12 }
   0x5   :  { %p63_p3 = por %p62_p2, %p61_p1 }
   0x7   :  { %p64_p4 = pnand %p63_p3, %p57_p0 }
   0x9   :  { %67 = shalt.err (!%p64_p4)
}
   0xa   :  { %s70_s13 = smov [#allocation2]  }
   0xb   :  { %17 = dma.vmem_to_smem %s15_s11, 16, %s70_s13, [#allocation3]  }
   0xc   :  { %68 = dma.done.wait [#allocation3], 16  }
   0xd   :  { %69 = vsyncadd [#allocation3], 4294967280 }
   0xe   :  { %23 = sfence }
   0xf   :  { %s24_s14 = sld [smem:[#allocation2]]  ;;  %v27_v0 = vld [vmem:[%s99_s1] sm:$0x1]  ;;  %v50_v1 = vld [vmem:[%s99_s1 + $0x1] sm:$0x1] }
  0x10   :  { %s48_s15 = sld [smem:[#allocation2 + $0x1]] }
  0x11   :  { %s49_s16 = sld [smem:[#allocation2 + $0x2]] }
  0x15   :  { %v28_v2 = vstv %s24_s14 }
  0x16   :  { %v29_v3 = vmul.f32 %v28_v2, %v27_v0  ;;  %v32_v4 = vstv %s48_s15 }
  0x17   :  { %v33_v5 = vmul.f32 %v50_v1, %v32_v4  ;;  %v35_v6 = vstv %s49_s16 }
  0x19   :  { %v34_v7 = vadd.f32 %v33_v5, %v29_v3 }
  0x1b   :  { %v36_v8 = vadd.f32 %v35_v6, %v34_v7 }
  0x1d   :  { %v37_v9 = vsub.f32 0.0, %v36_v8 }
  0x1f   :  { %v38_v10 = vmul.f32 1.442695, %v37_v9 }
  0x21   :  { %52 = vpow2.f32 %v38_v10 }
  0x2e   :  { %v53_v11 = vpop.eup %52 }
  0x2f   :  { %v40_v12 = vadd.f32 1.0, %v53_v11 }
  0x31   :  { %54 = vrcp.f32 %v40_v12 }
  0x3e   :  { %v55_v13 = vpop.eup %54 }
  0x3f   :  { %42 = vst [vmem:[%s100_s2] sm:$0x1] %v55_v13 }
  0x40   :  { %47 = vsyncpa [#allocation3], 1 }

</bundles_post_ra>
